<compile_context>
chip_gen: v6e
topology: v6e:2x2x1
jax: 0.10.0
libtpu: 0.0.40
codegen_flags: <defaults>
</compile_context>

<pallas_src>
import jax
import jax.numpy as jnp
from jax.experimental import pallas as pl
from jax.experimental.pallas import tpu as pltpu

EPS = 1e-5


def _round_up(v, m):
    return ((v + m - 1) // m) * m


def prenorm_kernel(x_ref, w_ref, b_ref, o_ref):
    # x_ref: (block_m, D) tile of flattened tokens.
    x = x_ref[...].astype(jnp.float32)                         # (BM, D)
    d = x.shape[-1]
    inv_d = 1.0 / d

    # LayerNorm statistics over the full (unpadded) feature dim, f32 on VPU.
    mean = jnp.sum(x, axis=-1, keepdims=True) * inv_d
    centered = x - mean
    var = jnp.sum(centered * centered, axis=-1, keepdims=True) * inv_d
    xn = centered * jax.lax.rsqrt(var + EPS)                   # (BM, D)

    # fn = Linear(D, D) with the LN affine pre-folded into W'/b' (wrapper).
    # bf16 MXU operands (W' pre-cast in wrapper), f32 accumulation.
    y = jnp.dot(xn.astype(jnp.bfloat16), w_ref[...],
                preferred_element_type=jnp.float32)            # (BM, D)
    y = y + b_ref[...]
    o_ref[...] = y.astype(o_ref.dtype)


def prenorm_forward(x, gamma, beta, w, bias, *, block_m=1024, out_dtype=None):
    B, N, D = x.shape
    M = B * N
    out_dtype = x.dtype if out_dtype is None else jnp.dtype(out_dtype)

    # Fold the LN affine into the Linear:
    #   (z * gamma + beta) @ W + bias = z @ (gamma[:, None] * W) + (beta @ W + bias)
    w_fused = (gamma[:, None].astype(jnp.float32) * w.astype(jnp.float32))
    w_fused = w_fused.astype(jnp.bfloat16)                          # (D, D) pre-cast
    b_fused = (beta.astype(jnp.float32) @ w.astype(jnp.float32)
               + bias.astype(jnp.float32)).reshape(1, D)            # (1, D) f32

    # Flatten tokens; no padding, no copy.
    x2 = x.reshape(M, D)

    # Row-tile sizing: as large as the work allows (multiple of 8 sublanes);
    # if there is plenty of work, keep >= 2 grid blocks so v7x's two
    # TensorCores both get a "parallel" block.
    block_m = max(8, min(block_m, _round_up(M, 8)))
    if M > 1024 and pl.cdiv(M, block_m) < 2:
        block_m = _round_up(pl.cdiv(M, 2), 8)
    grid_m = pl.cdiv(M, block_m)

    # Scoped-VMEM budget for the actual footprint (explicit so v5e's 16 MiB
    # default and v7x's 64 MiB physical are both handled when tiles grow).
    x_bytes = jnp.dtype(x2.dtype).itemsize
    o_bytes = out_dtype.itemsize
    vmem_bytes = (2 * block_m * D * x_bytes        # x tile, double-buffered
                  + 2 * block_m * D * o_bytes      # out tile, double-buffered
                  + D * D * 2                      # W' bf16, single-buffered
                  + D * 4)                         # b' f32, single-buffered
    vmem_limit = int(min(max(vmem_bytes + (16 << 20), 32 << 20), 64 << 20))

    out = pl.pallas_call(
        prenorm_kernel,
        out_shape=jax.ShapeDtypeStruct((M, D), out_dtype),
        grid_spec=pltpu.PrefetchScalarGridSpec(
            num_scalar_prefetch=0,
            grid=(grid_m,),
            in_specs=[
                # Token tile: double-buffered stream over rows.
                pl.BlockSpec((block_m, D), lambda i: (i, 0)),
                # Grid-invariant operands: fetched once, single-buffered.
                pl.BlockSpec((D, D), lambda i: (0, 0),
                             pipeline_mode=pl.Buffered(1)),
                pl.BlockSpec((1, D), lambda i: (0, 0),
                             pipeline_mode=pl.Buffered(1)),
            ],
            out_specs=pl.BlockSpec((block_m, D), lambda i: (i, 0)),
        ),
        compiler_params=pltpu.CompilerParams(
            dimension_semantics=("parallel",),
            vmem_limit_bytes=vmem_limit,
        ),
    )(x2, w_fused, b_fused)

    return out.reshape(B, N, D)


def prenorm_reference(x, gamma, beta, w, bias):
    xf = x.astype(jnp.float32)
    mean = jnp.mean(xf, axis=-1, keepdims=True)
    var = jnp.mean((xf - mean) ** 2, axis=-1, keepdims=True)
    xn = (xf - mean) * jax.lax.rsqrt(var + EPS) * gamma + beta
    return (xn @ w + bias).astype(x.dtype)


if __name__ == "__main__":
    B, N, D = 2, 8, 32   # small shapes: batch=2, seq=8, hidden(dim)=32

    key = jax.random.PRNGKey(0)
    kx, kw, kb, kg, kbt = jax.random.split(key, 5)

    x = jax.random.normal(kx, (B, N, D), dtype=jnp.float32)

    # LayerNorm params (non-trivial so the affine-into-Linear fold is exercised).
    gamma = 1.0 + 0.1 * jax.random.normal(kg, (D,), dtype=jnp.float32)
    beta = 0.1 * jax.random.normal(kbt, (D,), dtype=jnp.float32)

    # Deterministic params for fn = Linear(D, D).
    w = jax.random.normal(kw, (D, D), dtype=jnp.float32) * 0.02
    bias = jax.random.normal(kb, (D,), dtype=jnp.float32) * 0.02

    out = prenorm_forward(x, gamma, beta, w, bias)
    out = jax.block_until_ready(out)

    ref = prenorm_reference(x, gamma, beta, w, bias)
    assert out.shape == (B, N, D)
    # bf16 MXU operands (f32 accumulation) -> loosened tolerance vs f32 reference.
    assert jnp.allclose(out, ref, atol=2e-2, rtol=2e-2), "mismatch vs reference"

    print("KERNEL_OK")
</pallas_src>

<mosaic_0001>
module attributes {stable_mosaic.version = 11 : i64} {
  func.func @prenorm_kernel(%arg0: i32, %arg1: memref<16x32xf32, #tpu.memory_space<vmem>>, %arg2: memref<32x32xbf16, #tpu.memory_space<vmem>>, %arg3: memref<1x32xf32, #tpu.memory_space<vmem>>, %arg4: memref<16x32xf32, #tpu.memory_space<vmem>>) attributes {dimension_semantics = [#tpu.dimension_semantics<parallel>], iteration_bounds = array<i64: 1>, scalar_prefetch = 0 : i64, scratch_operands = 0 : i64, tpu.core_type = #tpu.core_type<tc>, window_params = [{transform_indices = @transform_0, window_bounds = array<i64: 16, 32>}, {pipeline_mode = #tpu.pipeline_mode<synchronous>, transform_indices = @transform_1, window_bounds = array<i64: 32, 32>}, {pipeline_mode = #tpu.pipeline_mode<synchronous>, transform_indices = @transform_2, window_bounds = array<i64: 1, 32>}, {transform_indices = @transform_3, window_bounds = array<i64: 16, 32>}]} {
    %c0 = arith.constant 0 : index
    %c0_0 = arith.constant 0 : index
    %0 = vector.load %arg1[%c0, %c0_0] : memref<16x32xf32, #tpu.memory_space<vmem>>, vector<16x32xf32>
    %cst = arith.constant dense<0.000000e+00> : vector<16xf32>
    %1 = vector.multi_reduction <add>, %0, %cst [1] : vector<16x32xf32> to vector<16xf32>
    %2 = vector.shape_cast %1 : vector<16xf32> to vector<16x1xf32>
    %cst_1 = arith.constant 3.125000e-02 : f32
    %3 = vector.broadcast %cst_1 : f32 to vector<16x1xf32>
    %4 = arith.mulf %2, %3 : vector<16x1xf32>
    %5 = vector.broadcast %4 : vector<16x1xf32> to vector<16x32xf32>
    %6 = arith.subf %0, %5 : vector<16x32xf32>
    %7 = arith.mulf %6, %6 : vector<16x32xf32>
    %cst_2 = arith.constant dense<0.000000e+00> : vector<16xf32>
    %8 = vector.multi_reduction <add>, %7, %cst_2 [1] : vector<16x32xf32> to vector<16xf32>
    %9 = vector.shape_cast %8 : vector<16xf32> to vector<16x1xf32>
    %cst_3 = arith.constant 3.125000e-02 : f32
    %10 = vector.broadcast %cst_3 : f32 to vector<16x1xf32>
    %11 = arith.mulf %9, %10 : vector<16x1xf32>
    %cst_4 = arith.constant 9.99999974E-6 : f32
    %12 = vector.broadcast %cst_4 : f32 to vector<16x1xf32>
    %13 = arith.addf %11, %12 : vector<16x1xf32>
    %14 = math.rsqrt %13 : vector<16x1xf32>
    %15 = vector.broadcast %14 : vector<16x1xf32> to vector<16x32xf32>
    %16 = arith.mulf %6, %15 : vector<16x32xf32>
    %17 = arith.truncf %16 : vector<16x32xf32> to vector<16x32xbf16>
    %c0_5 = arith.constant 0 : index
    %c0_6 = arith.constant 0 : index
    %18 = vector.load %arg2[%c0_5, %c0_6] : memref<32x32xbf16, #tpu.memory_space<vmem>>, vector<32x32xbf16>
    %cst_7 = arith.constant dense<0.000000e+00> : vector<16x32xf32>
    %19 = tpu.matmul %17, %18, %cst_7 {dimension_numbers = #tpu.dot_dimension_numbers<[1], [0], [0], [1], [0, 0, 1, 1], [], []>} : vector<16x32xbf16>, vector<32x32xbf16>, vector<16x32xf32> -> vector<16x32xf32>
    %c0_8 = arith.constant 0 : index
    %c0_9 = arith.constant 0 : index
    %20 = vector.load %arg3[%c0_8, %c0_9] : memref<1x32xf32, #tpu.memory_space<vmem>>, vector<1x32xf32>
    %21 = vector.broadcast %20 : vector<1x32xf32> to vector<16x32xf32>
    %22 = arith.addf %19, %21 : vector<16x32xf32>
    %c0_10 = arith.constant 0 : index
    %c0_11 = arith.constant 0 : index
    %23 = vector.load %arg4[%c0_10, %c0_11] : memref<16x32xf32, #tpu.memory_space<vmem>>, vector<16x32xf32>
    tpu.vector_store %arg4[%c0_10, %c0_11], %22 {strides = array<i32>} : memref<16x32xf32, #tpu.memory_space<vmem>>, vector<16x32xf32>,
    return
  }
  func.func @transform_0(%arg0: i32) -> (i32, i32) {
    %c0_i32 = arith.constant 0 : i32
    %c0_i32_0 = arith.constant 0 : i32
    return %arg0, %c0_i32 : i32, i32
  }
  func.func @transform_1(%arg0: i32) -> (i32, i32) {
    %c0_i32 = arith.constant 0 : i32
    %c0_i32_0 = arith.constant 0 : i32
    %c0_i32_1 = arith.constant 0 : i32
    return %c0_i32, %c0_i32_0 : i32, i32
  }
  func.func @transform_2(%arg0: i32) -> (i32, i32) {
    %c0_i32 = arith.constant 0 : i32
    %c0_i32_0 = arith.constant 0 : i32
    %c0_i32_1 = arith.constant 0 : i32
    return %c0_i32, %c0_i32_0 : i32, i32
  }
  func.func @transform_3(%arg0: i32) -> (i32, i32) {
    %c0_i32 = arith.constant 0 : i32
    %c0_i32_0 = arith.constant 0 : i32
    return %arg0, %c0_i32 : i32, i32
  }
}

</mosaic_0001>

<bundles_post_ra>
// kernel: tpu_custom_call.1
= control target key start
LH: loop header
LB: loop body
LE: loop exit
PB: predicated region body
PF: predicated region fallthrough
CT: control target
= control target key end

     0   :  { %8 = vsyncpa [#allocation3], 0  ;;  %s311_s0 = inlined_call_operand.hbm [shape: f32[16,32], index: 0, kind: input, shape index: {}]   ;;  %s312_s1 = inlined_call_operand.hbm [shape: bf16[32,32], index: 1, kind: input, shape index: {}]   ;;  %s313_s2 = inlined_call_operand.vmem [shape: f32[1,32], index: 2, kind: input, shape index: {}]   ;;  %s314_s3 = inlined_call_operand.hbm [shape: f32[16,32], index: 3, kind: output, shape index: {}]  }
   0x1   :  { %9 = vsyncpa [#allocation6], 0 }
   0x2   :  { %10 = vsyncpa [#allocation4], 0  ;;  %s257_s12 = smov [#allocation2]  }
   0x3   :  { %s16_s13 = sshll.u32 %s257_s12, 4  ;;  %s17_s13 = int_to_ptr.vmem [resolvable:$true] %s16_s13 }
   0x4   :  { %s199_s14 = scalar_lea.vmem %s17_s13, 256  ;;  %p204_p1 = scmp.lt.s32.totalorder %s17_s13, %s17_s13 }
   0x5   :  { %p200_p0 = scmp.ne.s32.totalorder %s17_s13, %s199_s14  ;;  %p205_p2 = scmp.lt.s32.totalorder %s199_s14, %s199_s14 }
   0x7   :  { %p206_p3 = por %p205_p2, %p204_p1 }
   0x9   :  { %p207_p4 = pnand %p206_p3, %p200_p0 }
   0xb   :  { %210 = shalt.err (!%p207_p4)
}
   0xc   :  { %s258_s15 = smov 128   ;;  %s259_s16 = smov 8  }
   0xd   :  { %22 = dma.hbm_to_vmem [thread:$0]  %s311_s0, 256, %s17_s13, [#allocation3], %s258_s15, %s258_s15, %s259_s16  }
   0xe   :  { %s260_s19 = smov [#allocation5]  }
   0xf   :  { %s28_s20 = sshll.u32 %s260_s19, 4  ;;  %s29_s20 = int_to_ptr.vmem [resolvable:$true] %s28_s20 }
  0x10   :  { %s219_s21 = scalar_lea.vmem %s29_s20, 256  ;;  %p224_p6 = scmp.lt.s32.totalorder %s29_s20, %s29_s20 }
  0x11   :  { %p220_p5 = scmp.ne.s32.totalorder %s29_s20, %s219_s21  ;;  %p225_p7 = scmp.lt.s32.totalorder %s219_s21, %s219_s21 }
  0x13   :  { %p226_p8 = por %p225_p7, %p224_p6 }
  0x15   :  { %p227_p9 = pnand %p226_p8, %p220_p5 }
  0x17   :  { %230 = shalt.err (!%p227_p9)
}
  0x18   :  { %s261_s22 = smov 64   ;;  %s262_s23 = smov 4  }
  0x19   :  { %34 = dma.hbm_to_vmem [thread:$0]  %s312_s1, 256, %s29_s20, [#allocation6], %s261_s22, %s261_s22, %s262_s23  }
  0x1a   :  { %251 = dma.done.wait [#allocation3], 256  }
  0x1b   :  { %252 = vsyncadd [#allocation3], 4294967040 }
  0x1c   :  { %253 = dma.done.wait [#allocation6], 256  }
  0x1d   :  { %254 = vsyncadd [#allocation6], 4294967040  ;;  %vm46_vm0 = vcmask 261120   ;;  %v44_v0 = vld [vmem:[#allocation2] sm:$0xff]  ;;  %v45_v1 = vld [vmem:[#allocation2 + $0x8] sm:$0xff]  ;;  %v263_v15 = vmov 0.0  }
  0x1e   :  { %v47_v2 = vsel %vm46_vm0, %v44_v0, 0.0  ;;  %v50_v3 = vsel %vm46_vm0, %v45_v1, 0.0  ;;  %v185_v14 = vld [vmem:[#allocation5 + $0x8] sm:$0xff]   ;;  %168 = vmatprep.subr.bf16.mxu0 %v263_v15  ;;  %vm264_vm1 = vmmov 0   ;;  %v186_v16 = vld [vmem:[#allocation5] sm:$0xff]   ;;  %s265_s26 = smov [#allocation7]  }
  0x1f   :  { %48 = vadd.xlane.f32.xlu0 %v47_v2  ;;  %172 = vmatprep.mubr.msk.bf16.mxu0 %vm264_vm1, %v263_v15  ;;  %v161_v28 = vld [vmem:[%s313_s2] ss:$0 sm:$0xff]  ;;  %s148_s27 = sshll.u32 %s265_s26, 4  ;;  %s149_s27 = int_to_ptr.vmem [resolvable:$true] %s148_s27 }
  0x20   :  { %169 = vmatpush3.bf16.msra.mxu0 %v185_v14  ;;  %s231_s28 = scalar_lea.vmem %s149_s27, 256  ;;  %p236_p11 = scmp.lt.s32.totalorder %s149_s27, %s149_s27 }
  0x21   :  { %170 = vmatprep.subr.bf16.mxu0 %v263_v15  ;;  %p232_p10 = scmp.ne.s32.totalorder %s149_s27, %s231_s28  ;;  %p237_p12 = scmp.lt.s32.totalorder %s231_s28, %s231_s28 }
  0x23   :  { %51 = vadd.xlane.f32.xlu0 %v50_v3  ;;  %p238_p13 = por %p237_p12, %p236_p11 }
  0x24   :  { %171 = vmatpush3.bf16.msra.mxu0 %v186_v16 }
  0x25   :  { %p239_p0 = pnand %p238_p13, %p232_p10 }
  0xa8   :  { %v49_v4 = vpop.xlane.xlu0 %48 }
  0xa9   :  { %v53_v5 = vmul.f32 0.03125, %v49_v4 }
  0xab   :  { %v55_v6 = vsub.f32 %v44_v0, %v53_v5 }
  0xac   :  { %v52_v7 = vpop.xlane.xlu0 %51 }
  0xad   :  { %v54_v8 = vmul.f32 0.03125, %v52_v7  ;;  %v57_v9 = vmul.f32 %v55_v6, %v55_v6 }
  0xaf   :  { %v56_v10 = vsub.f32 %v45_v1, %v54_v8  ;;  %v59_v11 = vsel %vm46_vm0, %v57_v9, 0.0 }
  0xb0   :  { %60 = vadd.xlane.f32.xlu1 %v59_v11 }
  0xb1   :  { %v58_v12 = vmul.f32 %v56_v10, %v56_v10 }
  0xb3   :  { %v62_v13 = vsel %vm46_vm0, %v58_v12, 0.0 }
  0xb4   :  { %63 = vadd.xlane.f32.xlu1 %v62_v13 }
 0x139   :  { %v61_v17 = vpop.xlane.xlu1 %60 }
 0x13a   :  { %v65_v18 = vmul.f32 0.03125, %v61_v17 }
 0x13c   :  { %v67_v19 = vadd.f32 1e-05, %v65_v18 }
 0x13d   :  { %v64_v20 = vpop.xlane.xlu1 %63 }
 0x13e   :  { %v66_v21 = vmul.f32 0.03125, %v64_v20  ;;  %187 = vrsqrt.f32 %v67_v19 }
 0x140   :  { %v68_v22 = vadd.f32 1e-05, %v66_v21 }
 0x142   :  { %189 = vrsqrt.f32 %v68_v22 }
 0x14b   :  { %v188_v23 = vpop.eup %187 }
 0x14c   :  { %v71_v25 = vmul.f32 %v188_v23, %v55_v6 }
 0x14f   :  { %v190_v24 = vpop.eup %189 }
 0x150   :  { %v72_v26 = vmul.f32 %v190_v24, %v56_v10 }
 0x152   :  { %v73_v27 = vpack.c.bf16 %v72_v26, %v71_v25 }
 0x154   :  { %173 = vmatmul.mubr.msk.bf16.vlgmr.msra.gmra.mxu0 %vm46_vm0, %v73_v27 }
 0x214   :  { %v134_v29 = vpop.f32.mrf.mxu0 }
 0x215   :  { %v135_v30 = vadd.f32 %v161_v28, %v134_v29 }
 0x216   :  { %v174_v31 = vpop.f32.mrf.mxu0 }
 0x217   :  { %141 = vst.msk [vmem:[#allocation7] sm:$0xff] %vm46_vm0, %v135_v30 }
 0x218   :  { %v137_v32 = vpop.f32.mrf.mxu0 }
 0x219   :  { %v138_v33 = vadd.f32 %v161_v28, %v137_v32 }
 0x21a   :  { %v175_v34 = vpop.f32.mrf.mxu0 }
 0x21b   :  { %142 = vst.msk [vmem:[#allocation7 + $0x8] sm:$0xff] %vm46_vm0, %v138_v33 }
 0x21c   :  { %242 = shalt.err (!%p239_p0)
}
 0x21d   :  { %154 = dma.vmem_to_hbm [thread:$0]  %s149_s27, 256, %s314_s3, [#allocation4], %s258_s15, %s258_s15, %s259_s16  }
 0x21e   :  { %255 = dma.done.wait [#allocation4], 256  }
 0x21f   :  { %256 = vsyncadd [#allocation4], 4294967040 }
 0x220   :  { %158 = vsyncpa [#allocation3], 1 }
 0x221   :  { %159 = vsyncpa [#allocation6], 1 }
 0x222   :  { %160 = vsyncpa [#allocation4], 1 }

</bundles_post_ra>
